<compile_context>
chip_gen: v7x
topology: tpu7x:2x2x1
jax: 0.10.0
libtpu: 0.0.40
codegen_flags: <defaults>
</compile_context>

<pallas_src>
import functools

import jax
import jax.numpy as jnp
from jax.experimental import pallas as pl
from jax.experimental.pallas import tpu as pltpu


def _round_up(x, m):
    return (x + m - 1) // m * m


def _sublane_multiple(dtype):
    # f32 -> 8, bf16 -> 16, int8/fp8 -> 32 (packed sublane tiles).
    return max(8, 32 // jnp.dtype(dtype).itemsize)


def _center_loss_kernel(feat_ref, cent_ref, out_ref, *, tb, batch):
    i = pl.program_id(0)
    base = i * tb

    # ---- Pure VPU/EUP compute on the pipelined (tb, D) blocks ----
    f = feat_ref[...].astype(jnp.float32)                        # (tb, D)
    sq_norm = jnp.sum(f * f, axis=1, keepdims=True)              # (tb, 1)
    # x / max(||x||, 1e-12) == x * rsqrt(max(||x||^2, 1e-24))   (EUP, no divide)
    f_n = f * jax.lax.rsqrt(jnp.maximum(sq_norm, 1e-24))

    diff = f_n - cent_ref[...].astype(jnp.float32)               # (tb, D)
    row_sq = jnp.sum(diff * diff, axis=1, keepdims=True)         # (tb, 1)

    # Mask rows that are batch padding (global row index >= true batch).
    row_ids = jax.lax.broadcasted_iota(jnp.int32, (tb, 1), 0) + base
    row_sq = jnp.where(row_ids < batch, row_sq, 0.0)

    partial = jnp.sum(row_sq)
    # Lane-dense per-tile output slab; wrapper picks one element per tile.
    out_ref[...] = jnp.full((8, 128), partial, dtype=jnp.float32)


def _choose_tb(batch, dim, row_bytes, mult):
    """Batch tile targeting ~1 MiB of features per block (<= 4 MiB, <= 2048 rows)."""
    target = max(1, (1 << 20) // max(1, row_bytes))          # ~1 MiB per block
    cap = max(1, (4 << 20) // max(1, row_bytes))             # hard cap 4 MiB/block
    tb = max(256, min(2048, target))
    tb = min(tb, cap)
    tb = _round_up(tb, mult)
    tb = min(tb, _round_up(batch, mult))                     # never exceed padded batch
    return max(mult, tb)


def center_loss_net(features, labels, centers, reduction="mean"):
    """Pallas implementation of CenterLossNet.forward."""
    B, D = features.shape
    C, D2 = centers.shape
    assert D == D2

    if reduction == "sum":
        divisor = 2.0
    elif reduction == "mean":
        divisor = 2.0 * B
    else:
        raise ValueError(
            "ValueError: {0} is not a valid value for reduction".format(reduction))

    # Row gather in the wrapper (XLA gather streams at full HBM bandwidth);
    # the kernel then only sees two dense, pipelined (tb, D) streams.
    labels_i32 = labels.astype(jnp.int32).reshape(B)
    centers_batch = jnp.take(centers, labels_i32, axis=0)        # (B, D)

    feat_isz = jnp.dtype(features.dtype).itemsize
    cent_isz = jnp.dtype(centers_batch.dtype).itemsize
    mult = max(_sublane_multiple(features.dtype),
               _sublane_multiple(centers_batch.dtype))
    row_bytes = D * max(feat_isz, cent_isz)

    tb = _choose_tb(B, D, row_bytes, mult)
    padded_b = _round_up(B, tb)
    num_tiles = padded_b // tb

    if padded_b != B:
        pad = padded_b - B
        features_p = jnp.pad(features, ((0, pad), (0, 0)))
        centers_b_p = jnp.pad(centers_batch, ((0, pad), (0, 0)))
    else:
        features_p = features
        centers_b_p = centers_batch

    # Double-buffered input blocks + output slab, plus headroom; well under the
    # v7x scoped VMEM budget (blocks are capped at 4 MiB each).
    block_bytes = tb * D * (feat_isz + cent_isz)
    vmem_limit = min(max((2 * block_bytes) + (4 << 20), 16 << 20), 48 << 20)

    kernel = functools.partial(_center_loss_kernel, tb=tb, batch=B)

    out = pl.pallas_call(
        kernel,
        out_shape=jax.ShapeDtypeStruct((num_tiles * 8, 128), jnp.float32),
        grid_spec=pltpu.PrefetchScalarGridSpec(
            num_scalar_prefetch=0,
            grid=(num_tiles,),
            in_specs=[
                pl.BlockSpec((tb, D), lambda i: (i, 0)),   # features (pipelined)
                pl.BlockSpec((tb, D), lambda i: (i, 0)),   # gathered centers (pipelined)
            ],
            out_specs=pl.BlockSpec((8, 128), lambda i: (i, 0)),
        ),
        compiler_params=pltpu.CompilerParams(
            dimension_semantics=("parallel",),             # v7x: shard tiles on 2 TCs
            vmem_limit_bytes=vmem_limit),
    )(features_p, centers_b_p)

    partials = out[::8, 0]                                 # one value per tile
    return jnp.sum(partials) / divisor


def _reference(features, labels, centers, reduction="mean"):
    """Pure-JAX reference mirroring the PyTorch module."""
    norm = jnp.sqrt(jnp.sum(features.astype(jnp.float32) ** 2, axis=1, keepdims=True))
    f_n = features / jnp.maximum(norm, 1e-12)
    centers_batch = centers[labels.astype(jnp.int32)]
    s = jnp.sum((f_n - centers_batch) ** 2)
    if reduction == "sum":
        return s / 2.0
    return s / 2.0 / features.shape[0]


if __name__ == "__main__":
    key = jax.random.PRNGKey(0)
    k1, k2, k3, k4, k5, k6 = jax.random.split(key, 6)

    # --- Small test (matches module-implied shapes) ---
    cls_num, feature_dim, batch = 16, 32, 8
    centers = jax.random.normal(k1, (cls_num, feature_dim), dtype=jnp.float32)
    features = jax.random.normal(k2, (batch, feature_dim), dtype=jnp.float32)
    labels = jax.random.randint(k3, (batch,), 0, cls_num, dtype=jnp.int32)

    loss = center_loss_net(features, labels, centers, reduction="mean")
    jax.block_until_ready(loss)
    ref = _reference(features, labels, centers, reduction="mean")
    assert jnp.allclose(loss, ref, rtol=1e-5, atol=1e-5), (loss, ref)

    loss_sum = center_loss_net(features, labels, centers, reduction="sum")
    jax.block_until_ready(loss_sum)
    ref_sum = _reference(features, labels, centers, reduction="sum")
    assert jnp.allclose(loss_sum, ref_sum, rtol=1e-5, atol=1e-5), (loss_sum, ref_sum)

    # --- Padding / multi-row-tile path (exercises the masked tail) ---
    cls_num2, feature_dim2, batch2 = 64, 128, 300
    centers2 = jax.random.normal(k4, (cls_num2, feature_dim2), dtype=jnp.float32)
    features2 = jax.random.normal(k5, (batch2, feature_dim2), dtype=jnp.float32)
    labels2 = jax.random.randint(k6, (batch2,), 0, cls_num2, dtype=jnp.int32)

    loss2 = center_loss_net(features2, labels2, centers2, reduction="mean")
    jax.block_until_ready(loss2)
    ref2 = _reference(features2, labels2, centers2, reduction="mean")
    assert jnp.allclose(loss2, ref2, rtol=1e-4, atol=1e-4), (loss2, ref2)

    print("KERNEL_OK")
</pallas_src>

<mosaic_0001>
module attributes {stable_mosaic.version = 11 : i64} {
  func.func @_center_loss_kernel(%arg0: i32, %arg1: memref<8x32xf32, #tpu.memory_space<vmem>>, %arg2: memref<8x32xf32, #tpu.memory_space<vmem>>, %arg3: memref<8x128xf32, #tpu.memory_space<vmem>>) attributes {dimension_semantics = [#tpu.dimension_semantics<parallel>], iteration_bounds = array<i64: 1>, scalar_prefetch = 0 : i64, scratch_operands = 0 : i64, tpu.core_type = #tpu.core_type<tc>, window_params = [{transform_indices = @transform_0, window_bounds = array<i64: 8, 32>}, {transform_indices = @transform_1, window_bounds = array<i64: 8, 32>}, {transform_indices = @transform_2, window_bounds = array<i64: 8, 128>}]} {
    %c8_i32 = arith.constant 8 : i32
    %0 = arith.muli %arg0, %c8_i32 : i32
    %c0 = arith.constant 0 : index
    %c0_0 = arith.constant 0 : index
    %1 = vector.load %arg1[%c0, %c0_0] : memref<8x32xf32, #tpu.memory_space<vmem>>, vector<8x32xf32>
    %2 = arith.mulf %1, %1 : vector<8x32xf32>
    %cst = arith.constant dense<0.000000e+00> : vector<8xf32>
    %3 = vector.multi_reduction <add>, %2, %cst [1] : vector<8x32xf32> to vector<8xf32>
    %4 = vector.shape_cast %3 : vector<8xf32> to vector<8x1xf32>
    %cst_1 = arith.constant 1.000000e-24 : f32
    %5 = vector.broadcast %cst_1 : f32 to vector<8x1xf32>
    %6 = arith.maximumf %4, %5 : vector<8x1xf32>
    %7 = math.rsqrt %6 : vector<8x1xf32>
    %8 = vector.broadcast %7 : vector<8x1xf32> to vector<8x32xf32>
    %9 = arith.mulf %1, %8 : vector<8x32xf32>
    %c0_2 = arith.constant 0 : index
    %c0_3 = arith.constant 0 : index
    %10 = vector.load %arg2[%c0_2, %c0_3] : memref<8x32xf32, #tpu.memory_space<vmem>>, vector<8x32xf32>
    %11 = arith.subf %9, %10 : vector<8x32xf32>
    %12 = arith.mulf %11, %11 : vector<8x32xf32>
    %cst_4 = arith.constant dense<0.000000e+00> : vector<8xf32>
    %13 = vector.multi_reduction <add>, %12, %cst_4 [1] : vector<8x32xf32> to vector<8xf32>
    %14 = vector.shape_cast %13 : vector<8xf32> to vector<8x1xf32>
    %15 = tpu.iota {dimensions = array<i32: 0>} : vector<8x1xi32>
    %16 = vector.broadcast %0 : i32 to vector<8x1xi32>
    %17 = arith.addi %15, %16 : vector<8x1xi32>
    %c8_i32_5 = arith.constant 8 : i32
    %18 = vector.broadcast %c8_i32_5 : i32 to vector<8x1xi32>
    %19 = arith.cmpi slt, %17, %18 : vector<8x1xi32>
    %cst_6 = arith.constant 0.000000e+00 : f32
    %20 = vector.broadcast %cst_6 : f32 to vector<8x1xf32>
    %21 = arith.select %19, %14, %20 : vector<8x1xi1>, vector<8x1xf32>
    %22 = vector.shape_cast %21 : vector<8x1xf32> to vector<1x8x1xf32>
    %cst_7 = arith.constant dense<0.000000e+00> : vector<1xf32>
    %23 = vector.multi_reduction <add>, %22, %cst_7 [1, 2] : vector<1x8x1xf32> to vector<1xf32>
    %24 = vector.shape_cast %23 : vector<1xf32> to vector<1x1x1xf32>
    %25 = vector.extract %24[0, 0, 0] : f32 from vector<1x1x1xf32>
    %26 = vector.broadcast %25 : f32 to vector<8x128xf32>
    %c0_8 = arith.constant 0 : index
    %c0_9 = arith.constant 0 : index
    %27 = vector.load %arg3[%c0_8, %c0_9] : memref<8x128xf32, #tpu.memory_space<vmem>>, vector<8x128xf32>
    tpu.vector_store %arg3[%c0_8, %c0_9], %26 {strides = array<i32>} : memref<8x128xf32, #tpu.memory_space<vmem>>, vector<8x128xf32>,
    return
  }
  func.func @transform_0(%arg0: i32) -> (i32, i32) {
    %c0_i32 = arith.constant 0 : i32
    %c0_i32_0 = arith.constant 0 : i32
    return %arg0, %c0_i32 : i32, i32
  }
  func.func @transform_1(%arg0: i32) -> (i32, i32) {
    %c0_i32 = arith.constant 0 : i32
    %c0_i32_0 = arith.constant 0 : i32
    return %arg0, %c0_i32 : i32, i32
  }
  func.func @transform_2(%arg0: i32) -> (i32, i32) {
    %c0_i32 = arith.constant 0 : i32
    %c0_i32_0 = arith.constant 0 : i32
    return %arg0, %c0_i32 : i32, i32
  }
}

</mosaic_0001>

<bundles_post_ra>
// kernel: tpu_custom_call.1
= control target key start
LH: loop header
LB: loop body
LE: loop exit
PB: predicated region body
PF: predicated region fallthrough
CT: control target
= control target key end

     0   :  { %7 = vsyncpa [#allocation3], 0  ;;  %s220_s0 = inlined_call_operand.hbm [shape: f32[8,32], index: 0, kind: input, shape index: {}]   ;;  %s221_s1 = inlined_call_operand.hbm [shape: f32[8,32], index: 1, kind: input, shape index: {}]   ;;  %s222_s2 = inlined_call_operand.hbm [shape: f32[8,128], index: 2, kind: output, shape index: {}]  }
   0x1   :  { %8 = vsyncpa [#allocation6], 0 }
   0x2   :  { %9 = vsyncpa [#allocation4], 0  ;;  %s166_s9 = smov [#allocation2]   ;;  %s167_s11 = smov [#allocation5]  }
   0x3   :  { %s16_s10 = sshll.u32 %s166_s9, 4  ;;  %s26_s12 = sshll.u32 %s167_s11, 4  ;;  %s17_s10 = int_to_ptr.vmem [resolvable:$true] %s16_s10  ;;  %s27_s12 = int_to_ptr.vmem [resolvable:$true] %s26_s12 }
   0x4   :  { %s94_s15 = scalar_lea.hbm %s220_s0, 128 }
   0x5   :  { %p95_p0 = scmp.ne.s32.totalorder %s220_s0, %s94_s15  ;;  %p98_p1 = scmp.lt.u32.totalorder %s94_s15, %s220_s0 }
   0x7   :  { %p100_p2 = pnand %p98_p1, %p95_p0 }
   0x9   :  { %103 = shalt.err (!%p100_p2)
}
   0xa   :  { %s104_s20 = scalar_lea.vmem %s17_s10, 128  ;;  %p109_p4 = scmp.lt.s32.totalorder %s17_s10, %s17_s10 }
   0xb   :  { %p105_p3 = scmp.ne.s32.totalorder %s17_s10, %s104_s20  ;;  %p110_p5 = scmp.lt.s32.totalorder %s104_s20, %s104_s20 }
   0xd   :  { %p111_p6 = por %p110_p5, %p109_p4 }
   0xf   :  { %p112_p7 = pnand %p111_p6, %p105_p3 }
  0x11   :  { %115 = shalt.err (!%p112_p7)
}
  0x12   :  { %19 = dma.hbm_to_vmem [thread:$0]  %s220_s0, 128, %s17_s10, [#allocation3]  }
  0x13   :  { %s116_s25 = scalar_lea.hbm %s221_s1, 128 }
  0x14   :  { %p117_p8 = scmp.ne.s32.totalorder %s221_s1, %s116_s25  ;;  %p120_p9 = scmp.lt.u32.totalorder %s116_s25, %s221_s1 }
  0x16   :  { %p122_p10 = pnand %p120_p9, %p117_p8 }
  0x18   :  { %125 = shalt.err (!%p122_p10)
}
  0x19   :  { %s126_s30 = scalar_lea.vmem %s27_s12, 128  ;;  %p131_p12 = scmp.lt.s32.totalorder %s27_s12, %s27_s12 }
  0x1a   :  { %p127_p11 = scmp.ne.s32.totalorder %s27_s12, %s126_s30  ;;  %p132_p13 = scmp.lt.s32.totalorder %s126_s30, %s126_s30 }
  0x1c   :  { %p133_p0 = por %p132_p13, %p131_p12 }
  0x1e   :  { %p134_p1 = pnand %p133_p0, %p127_p11 }
  0x20   :  { %137 = shalt.err (!%p134_p1)
}
  0x21   :  { %29 = dma.hbm_to_vmem [thread:$0]  %s221_s1, 128, %s27_s12, [#allocation6]  }
  0x22   :  { %160 = dma.done.wait [#allocation3], 128  }
  0x23   :  { %161 = vsyncadd [#allocation3], 4294967168 }
  0x24   :  { %162 = dma.done.wait [#allocation6], 128  }
  0x25   :  { %163 = vsyncadd [#allocation6], 4294967168  ;;  %v37_v0 = vld [vmem:[#allocation2] sm:$0xff]  ;;  %vm39_vm0 = vcmask 261120   ;;  %v46_v6 = vld [vmem:[#allocation5] sm:$0xff]  ;;  %vm58_vm1 = vcmask 7168  }
  0x26   :  { %v38_v1 = vmul.f32 %v37_v0, %v37_v0  ;;  %s168_s1 = smov [#allocation7]  }
  0x27   :  { %s77_s4 = sshll.u32 %s168_s1, 4  ;;  %s78_s4 = int_to_ptr.vmem [resolvable:$true] %s77_s4 }
  0x28   :  { %v40_v2 = vsel %vm39_vm0, %v38_v1, 0.0  ;;  %s138_s6 = scalar_lea.vmem %s78_s4, 128  ;;  %p143_p3 = scmp.lt.s32.totalorder %s78_s4, %s78_s4 }
  0x29   :  { %41 = vadd.xlane.f32.xlu0 %v40_v2  ;;  %p139_p2 = scmp.ne.s32.totalorder %s78_s4, %s138_s6  ;;  %p144_p4 = scmp.lt.s32.totalorder %s138_s6, %s138_s6 }
  0x2b   :  { %p145_p5 = por %p144_p4, %p143_p3 }
  0x2d   :  { %p146_p6 = pnand %p145_p5, %p139_p2 }
  0xb6   :  { %v42_v3 = vpop.xlane.xlu0 %41 }
  0xb7   :  { %v43_v4 = vmax.f32 %v42_v3, 1e-24 }
  0xb9   :  { %92 = vrsqrt.f32 %v43_v4 }
  0xc3   :  { %v93_v5 = vpop.eup %92 }
  0xc4   :  { %v45_v7 = vmul.f32 %v93_v5, %v37_v0 }
  0xc6   :  { %v47_v8 = vsub.f32 %v45_v7, %v46_v6 }
  0xc8   :  { %v48_v9 = vmul.f32 %v47_v8, %v47_v8 }
  0xca   :  { %v49_v10 = vsel %vm39_vm0, %v48_v9, 0.0 }
  0xcb   :  { %50 = vadd.xlane.f32.xlu0 %v49_v10 }
 0x158   :  { %v51_v11 = vpop.xlane.xlu0 %50 }
 0x159   :  { %v59_v12 = vsel %vm58_vm1, %v51_v11, 0.0 }
 0x15a   :  { %60 = vadd.xlane.f32.xlu1 %v59_v12 }
 0x1e7   :  { %v61_v13 = vpop.xlane.xlu1 %60 }
 0x1e8   :  { %v62_v14 = vrot.slane %v61_v13, 4 }
 0x1ea   :  { %v63_v15 = vadd.f32 %v62_v14, %v61_v13 }
 0x1ec   :  { %v64_v16 = vrot.slane %v63_v15, 2 }
 0x1ee   :  { %v65_v17 = vadd.f32 %v64_v16, %v63_v15 }
 0x1f0   :  { %v66_v18 = vrot.slane %v65_v17, 1 }
 0x1f2   :  { %v67_v19 = vadd.f32 %v66_v18, %v65_v17 }
 0x1f4   :  { %87 = vpush %v67_v19 }
 0x225   :  { %s88_s5 = spop %87 }
 0x226   :  { %v69_v20 = vstv %s88_s5 }
 0x227   :  { %70 = vst [vmem:[#allocation7] sm:$0xff] %v69_v20 }
 0x228   :  { %149 = shalt.err (!%p146_p6)
}
 0x229   :  { %s150_s9 = scalar_lea.hbm %s222_s2, 128 }
 0x22a   :  { %p151_p7 = scmp.ne.s32.totalorder %s222_s2, %s150_s9  ;;  %p154_p8 = scmp.lt.u32.totalorder %s150_s9, %s222_s2 }
 0x22c   :  { %p156_p9 = pnand %p154_p8, %p151_p7 }
 0x22e   :  { %159 = shalt.err (!%p156_p9)
}
 0x22f   :  { %80 = dma.vmem_to_hbm [thread:$0]  %s78_s4, 128, %s222_s2, [#allocation4]  }
 0x230   :  { %164 = dma.done.wait [#allocation4], 128  }
 0x231   :  { %165 = vsyncadd [#allocation4], 4294967168 }
 0x232   :  { %84 = vsyncpa [#allocation3], 1 }
 0x233   :  { %85 = vsyncpa [#allocation6], 1 }
 0x234   :  { %86 = vsyncpa [#allocation4], 1 }

</bundles_post_ra>
